<compile_context>
chip_gen: v7x
topology: tpu7x:2x2x1
jax: 0.10.0
libtpu: 0.0.40
codegen_flags: <defaults>
</compile_context>

<pallas_src>
import functools

import jax
import jax.numpy as jnp
from jax.experimental import pallas as pl
from jax.experimental.pallas import tpu as pltpu

EPS = 1e-5  # FeatureExtractor.eps


def _round_up(v, m):
    return ((v + m - 1) // m) * m


def _feature_extractor_kernel(main_ref, tail_ref, o_ref, rows_ref, *,
                              frame_len, hop, frame_tile, n_full, rem, tail_rows):
    ft = frame_tile
    # Stage the (ft + tail_rows, H) row window once into a persistent f32 scratch
    # (replaces the per-step lane-wide concatenate of main+tail).
    rows_ref[0:ft, :] = main_ref[0].astype(jnp.float32)
    rows_ref[ft:ft + tail_rows, :] = tail_ref[0].astype(jnp.float32)
    rows = rows_ref[...]

    # Per-row (H-wide) partial sums -> thin (rows, 1) columns.
    s = jnp.sum(rows, axis=-1, keepdims=True)
    q = jnp.sum(rows * rows, axis=-1, keepdims=True)

    # Per-frame sum / sumsq via n_full sublane-shifted adds of the thin columns.
    if n_full:
        fsum = s[0:ft]
        fsq = q[0:ft]
        for c in range(1, n_full):
            fsum = fsum + s[c:c + ft]
            fsq = fsq + q[c:c + ft]
    else:
        fsum = jnp.zeros((ft, 1), jnp.float32)
        fsq = jnp.zeros((ft, 1), jnp.float32)
    if rem:
        part = rows[n_full:n_full + ft, :rem]
        fsum = fsum + jnp.sum(part, axis=-1, keepdims=True)
        fsq = fsq + jnp.sum(part * part, axis=-1, keepdims=True)

    inv_n = 1.0 / frame_len
    mean = fsum * inv_n
    # Clamp the one-pass variance: E[x^2] - mean^2 can cancel slightly negative.
    var = jnp.maximum(fsq * inv_n - mean * mean, 0.0)
    inv_std = jax.lax.rsqrt(var + EPS)

    # Emit normalized frames chunk-wise (static sublane/lane offsets); never
    # materializes a full (ft, N) frames tile.
    for c in range(n_full):
        o_ref[0, :, c * hop:(c + 1) * hop] = (
            (rows[c:c + ft, :] - mean) * inv_std).astype(o_ref.dtype)
    if rem:
        o_ref[0, :, n_full * hop:frame_len] = (
            (rows[n_full:n_full + ft, :rem] - mean) * inv_std).astype(o_ref.dtype)


def feature_extractor_forward(x, N, H, *, frame_tile=1024, out_dtype=None):
    """x: (batch, num_samples) -> (batch, num_frames, N) normalized frames."""
    B, S = x.shape
    if S < N:
        raise ValueError(f"num_samples ({S}) must be >= frame length N ({N})")
    F = (S - N) // H + 1
    out_dtype = x.dtype if out_dtype is None else out_dtype

    n_full, rem = divmod(N, H)
    k_rows = n_full + (1 if rem else 0)          # H-sample rows touched per frame
    tail_rows = _round_up(max(k_rows - 1, 1), 8)  # overlap rows from the next tile
    align = tail_rows                             # ft must be a multiple of tail_rows

    # Frames per grid step: big tiles amortize the ~0.35us/step overhead; bounded by
    # an honest VMEM model (double-buffered I/O + scratch + in-kernel temporaries).
    ft = _round_up(max(min(frame_tile, F), align), align)

    def vmem_bytes(ft_):
        io = 2 * 4 * (ft_ * H + tail_rows * H + ft_ * N)       # double-buffered blocks
        scratch = 4 * (ft_ + tail_rows) * H                    # staging scratch
        temps = 2 * 4 * ft_ * H + 32 * ft_                     # chunk temp + thin cols
        return io + scratch + temps

    VMEM_BUDGET = 28 * 1024 * 1024
    while ft > align and vmem_bytes(ft) > VMEM_BUDGET:
        ft -= align

    T = pl.cdiv(F, ft)
    F_pad = T * ft
    R_pad = T * ft + tail_rows                   # H-sample rows incl. last tile's tail
    S_pad = R_pad * H

    # Row view of the signal (free reshape); pad only when samples are missing.
    if S == S_pad:
        sig = x
    elif S > S_pad:
        sig = x[:, :S_pad]
    else:
        sig = jnp.pad(x, ((0, 0), (0, S_pad - S)))
    xr = sig.reshape(B, R_pad, H)

    kernel = functools.partial(_feature_extractor_kernel,
                               frame_len=N, hop=H, frame_tile=ft,
                               n_full=n_full, rem=rem, tail_rows=tail_rows)

    ft_over_tail = ft // tail_rows
    if B == 1:
        grid = (T,)
        in_specs = [
            pl.BlockSpec((1, ft, H), lambda j: (0, j, 0)),
            pl.BlockSpec((1, tail_rows, H), lambda j: (0, (j + 1) * ft_over_tail, 0)),
        ]
        out_specs = pl.BlockSpec((1, ft, N), lambda j: (0, j, 0))
        dims = ("parallel",)
    else:
        grid = (B, T)
        in_specs = [
            pl.BlockSpec((1, ft, H), lambda b, j: (b, j, 0)),
            pl.BlockSpec((1, tail_rows, H), lambda b, j: (b, (j + 1) * ft_over_tail, 0)),
        ]
        out_specs = pl.BlockSpec((1, ft, N), lambda b, j: (b, j, 0))
        dims = ("parallel", "parallel")

    vmem_limit = int(min(64 * 1024 * 1024,
                         max(16 * 1024 * 1024, 2 * vmem_bytes(ft))))

    out = pl.pallas_call(
        kernel,
        out_shape=jax.ShapeDtypeStruct((B, F_pad, N), out_dtype),
        grid=grid,
        in_specs=in_specs,
        out_specs=out_specs,
        scratch_shapes=[pltpu.VMEM((ft + tail_rows, H), jnp.float32)],
        compiler_params=pltpu.CompilerParams(
            dimension_semantics=dims,
            vmem_limit_bytes=vmem_limit,
        ),
    )(xr, xr)

    if F_pad != F:
        out = out[:, :F, :]
    return out


def _reference(x, N, H):
    B, S = x.shape
    F = (S - N) // H + 1
    idx = jnp.arange(F)[:, None] * H + jnp.arange(N)[None, :]  # (F, N)
    frames = x[:, idx]                                         # (B, F, N)
    mean = jnp.mean(frames, axis=-1, keepdims=True)
    var = jnp.mean((frames - mean) ** 2, axis=-1, keepdims=True)
    return (frames - mean) / jnp.sqrt(var + EPS)


if __name__ == "__main__":
    key = jax.random.PRNGKey(0)
    configs = [
        # (B, N, H, num_frames)
        (2, 256, 128, 128),   # lane-aligned fast path (N, H multiples of 128)
        (2, 32, 16, 16),      # small unaligned config (masked load/store path)
        (1, 256, 128, 200),   # B == 1 path (grid over frame tiles only)
    ]
    for cfg_idx, (B, N, H, F) in enumerate(configs):
        S = (F - 1) * H + N
        key, sub = jax.random.split(key)
        # Non-zero mean input exercises the clamped one-pass variance.
        x = jax.random.normal(sub, (B, S), dtype=jnp.float32) + 0.5

        out = jax.block_until_ready(feature_extractor_forward(x, N, H))
        ref = _reference(x, N, H)

        assert out.shape == (B, F, N), (cfg_idx, out.shape, (B, F, N))
        assert jnp.allclose(out, ref, atol=1e-4, rtol=1e-4), f"mismatch in config {cfg_idx}"

    print("KERNEL_OK")
</pallas_src>

<mosaic_0001>
module attributes {stable_mosaic.version = 11 : i64} {
  func.func @_feature_extractor_kernel(%arg0: i32, %arg1: i32, %arg2: memref<1x128x128xf32, #tpu.memory_space<vmem>>, %arg3: memref<1x8x128xf32, #tpu.memory_space<vmem>>, %arg4: memref<1x128x256xf32, #tpu.memory_space<vmem>>, %arg5: memref<136x128xf32, #tpu.memory_space<vmem>>) attributes {dimension_semantics = [#tpu.dimension_semantics<parallel>, #tpu.dimension_semantics<parallel>], iteration_bounds = array<i64: 2, 1>, scalar_prefetch = 0 : i64, scratch_operands = 1 : i64, tpu.core_type = #tpu.core_type<tc>, window_params = [{transform_indices = @transform_0, window_bounds = array<i64: 1, 128, 128>}, {transform_indices = @transform_1, window_bounds = array<i64: 1, 8, 128>}, {transform_indices = @transform_2, window_bounds = array<i64: 1, 128, 256>}]} {
    %c0 = arith.constant 0 : index
    %c0_0 = arith.constant 0 : index
    %c0_1 = arith.constant 0 : index
    %0 = vector.load %arg2[%c0, %c0_0, %c0_1] : memref<1x128x128xf32, #tpu.memory_space<vmem>>, vector<1x128x128xf32>
    %1 = vector.shape_cast %0 : vector<1x128x128xf32> to vector<128x128xf32>
    %c0_2 = arith.constant 0 : index
    %c0_3 = arith.constant 0 : index
    %2 = vector.load %arg5[%c0_2, %c0_3] : memref<136x128xf32, #tpu.memory_space<vmem>>, vector<128x128xf32>
    tpu.vector_store %arg5[%c0_2, %c0_3], %1 {strides = array<i32>} : memref<136x128xf32, #tpu.memory_space<vmem>>, vector<128x128xf32>,
    %c0_4 = arith.constant 0 : index
    %c0_5 = arith.constant 0 : index
    %c0_6 = arith.constant 0 : index
    %3 = vector.load %arg3[%c0_4, %c0_5, %c0_6] : memref<1x8x128xf32, #tpu.memory_space<vmem>>, vector<1x8x128xf32>
    %4 = vector.shape_cast %3 : vector<1x8x128xf32> to vector<8x128xf32>
    %c128 = arith.constant 128 : index
    %c0_7 = arith.constant 0 : index
    %5 = vector.load %arg5[%c128, %c0_7] : memref<136x128xf32, #tpu.memory_space<vmem>>, vector<8x128xf32>
    tpu.vector_store %arg5[%c128, %c0_7], %4 {strides = array<i32>} : memref<136x128xf32, #tpu.memory_space<vmem>>, vector<8x128xf32>,
    %c0_8 = arith.constant 0 : index
    %c0_9 = arith.constant 0 : index
    %6 = vector.load %arg5[%c0_8, %c0_9] : memref<136x128xf32, #tpu.memory_space<vmem>>, vector<136x128xf32>
    %cst = arith.constant dense<0.000000e+00> : vector<136xf32>
    %7 = vector.multi_reduction <add>, %6, %cst [1] : vector<136x128xf32> to vector<136xf32>
    %8 = vector.shape_cast %7 : vector<136xf32> to vector<136x1xf32>
    %9 = arith.mulf %6, %6 : vector<136x128xf32>
    %cst_10 = arith.constant dense<0.000000e+00> : vector<136xf32>
    %10 = vector.multi_reduction <add>, %9, %cst_10 [1] : vector<136x128xf32> to vector<136xf32>
    %11 = vector.shape_cast %10 : vector<136xf32> to vector<136x1xf32>
    %12 = vector.extract_strided_slice %8 {offsets = [0, 0], sizes = [128, 1], strides = [1, 1]} : vector<136x1xf32> to vector<128x1xf32>
    %13 = vector.extract_strided_slice %11 {offsets = [0, 0], sizes = [128, 1], strides = [1, 1]} : vector<136x1xf32> to vector<128x1xf32>
    %14 = vector.extract_strided_slice %8 {offsets = [1, 0], sizes = [128, 1], strides = [1, 1]} : vector<136x1xf32> to vector<128x1xf32>
    %15 = arith.addf %12, %14 : vector<128x1xf32>
    %16 = vector.extract_strided_slice %11 {offsets = [1, 0], sizes = [128, 1], strides = [1, 1]} : vector<136x1xf32> to vector<128x1xf32>
    %17 = arith.addf %13, %16 : vector<128x1xf32>
    %cst_11 = arith.constant 3.906250e-03 : f32
    %18 = vector.broadcast %cst_11 : f32 to vector<128x1xf32>
    %19 = arith.mulf %15, %18 : vector<128x1xf32>
    %cst_12 = arith.constant 3.906250e-03 : f32
    %20 = vector.broadcast %cst_12 : f32 to vector<128x1xf32>
    %21 = arith.mulf %17, %20 : vector<128x1xf32>
    %22 = arith.mulf %19, %19 : vector<128x1xf32>
    %23 = arith.subf %21, %22 : vector<128x1xf32>
    %cst_13 = arith.constant 0.000000e+00 : f32
    %24 = vector.broadcast %cst_13 : f32 to vector<128x1xf32>
    %25 = arith.maximumf %23, %24 : vector<128x1xf32>
    %cst_14 = arith.constant 9.99999974E-6 : f32
    %26 = vector.broadcast %cst_14 : f32 to vector<128x1xf32>
    %27 = arith.addf %25, %26 : vector<128x1xf32>
    %28 = math.rsqrt %27 : vector<128x1xf32>
    %29 = vector.extract_strided_slice %6 {offsets = [0, 0], sizes = [128, 128], strides = [1, 1]} : vector<136x128xf32> to vector<128x128xf32>
    %30 = vector.broadcast %19 : vector<128x1xf32> to vector<128x128xf32>
    %31 = arith.subf %29, %30 : vector<128x128xf32>
    %32 = vector.broadcast %28 : vector<128x1xf32> to vector<128x128xf32>
    %33 = arith.mulf %31, %32 : vector<128x128xf32>
    %c0_15 = arith.constant 0 : index
    %c0_16 = arith.constant 0 : index
    %c0_17 = arith.constant 0 : index
    %34 = vector.load %arg4[%c0_15, %c0_16, %c0_17] : memref<1x128x256xf32, #tpu.memory_space<vmem>>, vector<1x128x128xf32>
    %35 = vector.shape_cast %34 : vector<1x128x128xf32> to vector<128x128xf32>
    %36 = vector.shape_cast %33 : vector<128x128xf32> to vector<1x128x128xf32>
    tpu.vector_store %arg4[%c0_15, %c0_16, %c0_17], %36 {strides = array<i32>} : memref<1x128x256xf32, #tpu.memory_space<vmem>>, vector<1x128x128xf32>,
    %37 = vector.extract_strided_slice %6 {offsets = [1, 0], sizes = [128, 128], strides = [1, 1]} : vector<136x128xf32> to vector<128x128xf32>
    %38 = vector.broadcast %19 : vector<128x1xf32> to vector<128x128xf32>
    %39 = arith.subf %37, %38 : vector<128x128xf32>
    %40 = vector.broadcast %28 : vector<128x1xf32> to vector<128x128xf32>
    %41 = arith.mulf %39, %40 : vector<128x128xf32>
    %c0_18 = arith.constant 0 : index
    %c0_19 = arith.constant 0 : index
    %c128_20 = arith.constant 128 : index
    %42 = vector.load %arg4[%c0_18, %c0_19, %c128_20] : memref<1x128x256xf32, #tpu.memory_space<vmem>>, vector<1x128x128xf32>
    %43 = vector.shape_cast %42 : vector<1x128x128xf32> to vector<128x128xf32>
    %44 = vector.shape_cast %41 : vector<128x128xf32> to vector<1x128x128xf32>
    tpu.vector_store %arg4[%c0_18, %c0_19, %c128_20], %44 {strides = array<i32>} : memref<1x128x256xf32, #tpu.memory_space<vmem>>, vector<1x128x128xf32>,
    return
  }
  func.func @transform_0(%arg0: i32, %arg1: i32) -> (i32, i32, i32) {
    %c0_i32 = arith.constant 0 : i32
    %c0_i32_0 = arith.constant 0 : i32
    return %arg0, %arg1, %c0_i32 : i32, i32, i32
  }
  func.func @transform_1(%arg0: i32, %arg1: i32) -> (i32, i32, i32) {
    %c1_i32 = arith.constant 1 : i32
    %0 = arith.addi %arg1, %c1_i32 : i32
    %c16_i32 = arith.constant 16 : i32
    %1 = arith.muli %0, %c16_i32 : i32
    %c0_i32 = arith.constant 0 : i32
    %c0_i32_0 = arith.constant 0 : i32
    return %arg0, %1, %c0_i32 : i32, i32, i32
  }
  func.func @transform_2(%arg0: i32, %arg1: i32) -> (i32, i32, i32) {
    %c0_i32 = arith.constant 0 : i32
    %c0_i32_0 = arith.constant 0 : i32
    return %arg0, %arg1, %c0_i32 : i32, i32, i32
  }
}

</mosaic_0001>

<bundles_post_ra>
// kernel: tpu_custom_call.1
= control target key start
LH: loop header
LB: loop body
LE: loop exit
PB: predicated region body
PF: predicated region fallthrough
CT: control target
= control target key end

     0   :  { %7 = vsyncpa [#allocation4], 0  ;;  %s2138_s0 = inlined_call_operand.hbm [shape: f32[2,136,128], index: 0, kind: input, shape index: {}]   ;;  %s2139_s1 = inlined_call_operand.hbm [shape: f32[2,136,128], index: 1, kind: input, shape index: {}]   ;;  %s2140_s2 = inlined_call_operand.hbm [shape: f32[2,128,256], index: 2, kind: output, shape index: {}]  }
   0x1   :  { %9 = vsyncpa [#allocation4 + $0x1], 0 }
   0x2   :  { %10 = vsyncpa [#allocation7], 0 }
   0x3   :  { %12 = vsyncpa [#allocation7 + $0x1], 0 }
   0x4   :  { %13 = vsyncpa [#allocation5], 0 }
   0x5   :  { %15 = vsyncpa [#allocation5 + $0x1], 0  ;;  %s1506_s9 = smov 0   ;;  %s1508_s10 = smov 0  }
   0x6   :  { %s1510_s11 = smov 0   ;;  %s1512_s12 = smov 0  }
   0x7   :  { %s1514_s13 = smov 0   ;;  %s1516_s14 = smov 0  }
   0x8 LB: > { %s1206_s15 = sadd.s32 4294967295, %s1481_s14   ;;  %s1207_s16 = sadd.s32 4294967294, %s1481_s14   ;;  %s1481_s14 = sphi %s1516_s14, %s21_s14   ;;  %s1477_s13 = sphi %s1514_s13, %s2159_s13   ;;  %s1473_s12 = sphi %s1512_s12, %s2158_s12   ;;  %s1469_s11 = sphi %s1510_s11, %s2157_s11   ;;  %s1465_s10 = sphi %s1508_s10, %s2156_s10   ;;  %s1461_s9 = sphi %s1506_s9, %s2155_s9  }
   0x9   : > { %s33_s17 = sadd.s32 1, %s1477_s13  ;;  %s42_s18 = sadd.s32 1, %s1469_s11 }
   0xa   : > { %p35_p0 = scmp.ge.s32.totalorder %s33_s17, 2  ;;  %p49_p1 = scmp.ne.s32.totalorder %s1469_s11, %s1465_s10 }
   0xb   : > { %p50_p2 = scmp.eq.s32.totalorder %s1481_s14, 0  ;;  %p55_p3 = scmp.ne.s32.totalorder %s1465_s10, %s1461_s9 }
   0xc   : > { %s2161_s17 = smov (%p35_p0, %s33_s17), 0  ;;  %p56_p5 = scmp.eq.s32.totalorder %s1206_s15, 0 }
   0xd   : > { %p1547_p4 = por %p50_p2, %p49_p1  ;;  %s37_s20 = ssub.s32 %s1477_s13, %s2161_s17 }
   0xe   : > { %p113_p6 = scmp.eq.s32.totalorder %s1206_s15, 1  ;;  %p40_p7 = scmp.eq.s32.totalorder %s37_s20, 0 }
   0xf   : > { %p1553_p8 = por %p56_p5, %p55_p3  ;;  %p119_p10 = scmp.eq.s32.totalorder %s1207_s16, 1 }
  0x10   : > { %p1557_p9 = por %p113_p6, %p49_p1  ;;  %p1242_p13 = scmp.lt.s32.totalorder %s1481_s14, 2 }
  0x11   : > { %s2144_s21 = scalar_select %p1553_p8, 1, 0 }
  0x12   : > { %s2145_s22 = scalar_select %p1557_p9, 1, 0 }
  0x13   : > { %s1562_s23 = scalar_select %p40_p7, %s1469_s11, %s42_s18  }
  0x14   : > { %p1564_p11 = por %p119_p10, %p55_p3  ;;  %s1571_s25 = sand.u32 1, %s1469_s11  }
  0x15   : > { %s1210_s26 = sshll.u32 %s1571_s25, 7  ;;  %s1224_s27 = smul.u32 2176, %s1477_s13 }
  0x16   : > { %s2146_s24 = scalar_select %p1564_p11, 1, 0 }
  0x17   : > { %s143_s28 = scalar_lea.vmem [#allocation3], %s1210_s26  ;;  %p1577_p0 = pnand %p1242_p13, %p1547_p4 }
  0x18   : > { %s158_s29 = sshll.u32 %s143_s28, 4  ;;  %s1586_s5 = scalar_lea.hbm %s2138_s0, %s1224_s27  ;;  %s1588_s29 = int_to_ptr.vmem [resolvable:$true] %s158_s29 }
  0x19   : > { %s140_s6 = scalar_lea.sflag [#allocation4], %s1571_s25  ;;  %s1334_s7 = scalar_lea.hbm %s1586_s5, 2048 }
  0x1a   : > { %p1335_p2 = scmp.ne.s32.totalorder %s1586_s5, %s1334_s7  ;;  %p1336_p3 = pneg %p1577_p0 }
  0x1b   : > { %s1339_s16 = scalar_lea.hbm %s2138_s0, 4352  ;;  %p1340_p6 = scmp.lt.u32.totalorder %s1586_s5, %s2138_s0 }
  0x1c   : > { %p1337_p4 = pnand %p1336_p3, %p1335_p2  ;;  %p1341_p7 = scmp.lt.u32.totalorder %s1339_s16, %s1334_s7 }
  0x1d   : > { %p1343_p13 = scmp.lt.u32.totalorder %s1334_s7, %s1586_s5 }
  0x1e   : > { %p1338_p5 = pneg %p1337_p4  ;;  %p1342_p10 = por %p1341_p7, %p1340_p6 }
  0x20   : > { %p1344_p12 = por %p1343_p13, %p1342_p10 }
  0x22   : > { %p1345_p1 = pnand %p1344_p12, %p1338_p5 }
  0x24   : > { %1348 = shalt.err (!%p1345_p1)
}
  0x25   : > { %s1349_s20 = scalar_lea.vmem %s1588_s29, 2048  ;;  %s1483_s26 = smov [#allocation3]  }
  0x26   : > { %p1350_p2 = scmp.ne.s32.totalorder %s1588_s29, %s1349_s20  ;;  %s1354_s28 = sshll.u32 %s1483_s26, 4  ;;  %s1355_s28 = int_to_ptr.vmem [resolvable:$false] %s1354_s28 }
  0x27   : > { %s1356_s3 = scalar_lea.vmem %s1355_s28, 4096  ;;  %p1357_p9 = scmp.lt.s32.totalorder %s1588_s29, %s1355_s28 }
  0x28   : > { %p1352_p4 = pnand %p1350_p2, %p1336_p3  ;;  %p1358_p6 = scmp.lt.s32.totalorder %s1356_s3, %s1349_s20 }
  0x2a   : > { %p1353_p11 = pneg %p1352_p4  ;;  %p1359_p7 = por %p1358_p6, %p1357_p9 }
  0x2c   : > { %p1360_p10 = pnand %p1359_p7, %p1353_p11 }
  0x2e   : > { %1363 = shalt.err (!%p1360_p10)
}
  0x2f   : > { %s1484_s4 = smov 128   ;;  %s1485_s7 = smov 8  }
  0x30   : > { %1234 = dma.hbm_to_vmem [thread:$0]  (!%p1577_p0), %s1586_s5, 2048, %s1588_s29, %s140_s6, %s1484_s4, %s1484_s4, %s1485_s7  }
  0x31   : > { %p188_p12 = scmp.lt.s32.totalorder %s1481_s14, 3  ;;  %s1212_s8 = sshll.u32 %s1571_s25, 3 }
  0x32   : > { %s1137_s18 = scalar_lea.hbm %s2139_s1, %s1224_s27  ;;  %p2148_p9 = scmp.ge.s32.totalorder %s1481_s14, 1 }
  0x33   : > { %s1632_s20 = scalar_lea.hbm %s1137_s18, 2048  ;;  %s172_s26 = scalar_lea.vmem [#allocation6], %s1212_s8 }
  0x34   : > { %p1628_p11 = pnand %p2148_p9, %p188_p12  ;;  %s183_s28 = sshll.u32 %s172_s26, 4  ;;  %s184_s28 = int_to_ptr.vmem [resolvable:$true] %s183_s28 }
  0x35   : > { %s169_s29 = scalar_lea.sflag [#allocation7], %s1571_s25  ;;  %s1394_s5 = scalar_lea.hbm %s1137_s18, 2176 }
  0x36   : > { %s2149_s19 = scalar_select %p1628_p11, 1, 0 }
  0x37   : > { %p1365_p1 = scmp.ne.s32.totalorder %s1632_s20, %s1394_s5  ;;  %s1369_s3 = scalar_lea.hbm %s2139_s1, 4352 }
  0x38   : > { %p1370_p2 = scmp.lt.u32.totalorder %s1632_s20, %s2139_s1  ;;  %p1371_p4 = scmp.lt.u32.totalorder %s1369_s3, %s1394_s5 }
  0x39   : > { %p1367_p5 = pnand %p1365_p1, %p1336_p3  ;;  %p1373_p7 = scmp.lt.u32.totalorder %s1394_s5, %s1632_s20 }
  0x3a   : > { %p1372_p6 = por %p1371_p4, %p1370_p2 }
  0x3b   : > { %p1368_p13 = pneg %p1367_p5 }
  0x3c   : > { %p1374_p10 = por %p1373_p7, %p1372_p6 }
  0x3e   : > { %p1375_p12 = pnand %p1374_p10, %p1368_p13 }
  0x40   : > { %1378 = shalt.err (!%p1375_p12)
}
  0x41   : > { %s1379_s25 = scalar_lea.vmem %s184_s28, 128  ;;  %s1486_s8 = smov [#allocation6]  }
  0x42   : > { %p1380_p9 = scmp.ne.s32.totalorder %s184_s28, %s1379_s25  ;;  %s1384_s15 = sshll.u32 %s1486_s8, 4  ;;  %s1385_s15 = int_to_ptr.vmem [resolvable:$false] %s1384_s15 }
  0x43   : > { %s1386_s16 = scalar_lea.vmem %s1385_s15, 256  ;;  %p1387_p8 = scmp.lt.s32.totalorder %s184_s28, %s1385_s15 }
  0x44   : > { %p1382_p1 = pnand %p1380_p9, %p1336_p3  ;;  %p1388_p11 = scmp.lt.s32.totalorder %s1386_s16, %s1379_s25 }
  0x46   : > { %p1383_p5 = pneg %p1382_p1  ;;  %p1389_p2 = por %p1388_p11, %p1387_p8 }
  0x48   : > { %p1390_p4 = pnand %p1389_p2, %p1383_p5 }
  0x4a   : > { %1393 = shalt.err (!%p1390_p4)
}
  0x4b   : > { %1237 = dma.hbm_to_vmem [thread:$0]  (!%p1577_p0), %s1632_s20, 128, %s184_s28, %s169_s29  }
  0x4c   : > { %p2150_p13 = scmp.ne.s32.totalorder %s2149_s19, 0 }
  0x4d   : > { %s1656_s18 = sand.u32 (!%p2150_p13), 1, %s1465_s10   ;;  %p2151_p8 = scmp.ne.s32.totalorder (!%p2150_p13), %s2144_s21, 0 }
  0x4e   : > { %192 = sbr.rel (%p2150_p13) target bundleno = 473 (0x1d9), region = 28  ;;  %s1215_s26 = sshll.u32 (!%p2150_p13), %s1656_s18, 7 }
  0x4f   : > { %s195_s5 = scalar_lea.sflag (!%p2150_p13), [#allocation4], %s1656_s18  ;;  %s1660_s27 = scalar_lea.vmem (!%p2150_p13), [#allocation3], %s1215_s26 }
  0x55   : > { %1448 = dma.done.wait (%p2151_p8), %s195_s5, 2048  }
  0x56   : > { %1450 = vsyncadd (%p2151_p8), %s195_s5, 4294965248  ;;  %s1216_s30 = sshll.u32 %s1656_s18, 3  ;;  %s204_s19 = scalar_lea.sflag [#allocation7], %s1656_s18 }
  0x57   : > { %s1668_s20 = scalar_lea.vmem [#allocation6], %s1216_s30 }
  0x58   : > { %1452 = dma.done.wait (%p2151_p8), %s204_s19, 128  }
  0x59   : > { %1454 = vsyncadd (%p2151_p8), %s204_s19, 4294967168  ;;  %v1675_v0 = vld [vmem:[%s1660_s27 + $0x10] sm:$0xff]  ;;  %v1678_v1 = vld [vmem:[%s1660_s27] sm:$0xff]  ;;  %v1487_v16 = vmov 0   ;;  %vm394_vm0 = vcmask 1046528   ;;  %vm862_vm1 = vcmask 1040384  }
  0x5a   : > { %296 = vadd.xlane.f32.xlu1 %v1675_v0  ;;  %292 = vadd.xlane.f32.xlu0 %v1678_v1  ;;  %v1683_v2 = vld [vmem:[%s1660_s27 + $0x18] sm:$0xff]  ;;  %v1686_v3 = vld [vmem:[%s1660_s27 + $0x8] sm:$0xff]  ;;  %v1694_v5 = vld [vmem:[%s1660_s27 + $0x20] sm:$0xff]  ;;  %v326_v17 = vmul.f32 %v1678_v1, %v1678_v1  ;;  %v328_v20 = vmul.f32 %v1675_v0, %v1675_v0  ;;  %s1217_s21 = sshll.u32 %s1656_s18, 8  ;;  %s1223_s29 = sshll.u32 %s1473_s12, 12 }
  0x5b   : > { %v1691_v4 = vld [vmem:[%s1660_s27 + $0x28] sm:$0xff]  ;;  %v1699_v6 = vld [vmem:[%s1660_s27 + $0x38] sm:$0xff]  ;;  %v1702_v7 = vld [vmem:[%s1660_s27 + $0x30] sm:$0xff]  ;;  %1298 = vset.pattern.permute.xlu1 %v1487_v16  ;;  %1297 = vset.pattern.permute.xlu0 %v1487_v16  ;;  %v327_v19 = vmul.f32 %v1686_v3, %v1686_v3  ;;  %v329_v21 = vmul.f32 %v1683_v2, %v1683_v2  ;;  %v330_v22 = vmul.f32 %v1694_v5, %v1694_v5  ;;  %s1937_s28 = scalar_lea.vmem [#allocation8], %s1217_s21  ;;  %s2081_s7 = scalar_lea.hbm %s2140_s2, %s1223_s29 }
  0x5c   : > { %v1707_v8 = vld [vmem:[%s1660_s27 + $0x48] sm:$0xff]  ;;  %v1710_v9 = vld [vmem:[%s1660_s27 + $0x40] sm:$0xff]  ;;  %v1715_v10 = vld [vmem:[%s1660_s27 + $0x58] sm:$0xff]  ;;  %v331_v23 = vmul.f32 %v1691_v4, %v1691_v4  ;;  %v332_v24 = vmul.f32 %v1702_v7, %v1702_v7  ;;  %v333_v25 = vmul.f32 %v1699_v6, %v1699_v6  ;;  %s1092_s6 = sshll.u32 %s1937_s28, 4  ;;  %s1076_s12 = scalar_lea.sflag [#allocation5], %s1656_s18  ;;  %s2083_s6 = int_to_ptr.vmem [resolvable:$true] %s1092_s6 }
  0x5d   : > { %v1718_v11 = vld [vmem:[%s1660_s27 + $0x50] sm:$0xff]  ;;  %v1723_v12 = vld [vmem:[%s1660_s27 + $0x68] sm:$0xff]  ;;  %v1726_v13 = vld [vmem:[%s1660_s27 + $0x60] sm:$0xff]  ;;  %v334_v26 = vmul.f32 %v1710_v9, %v1710_v9  ;;  %v335_v27 = vmul.f32 %v1707_v8, %v1707_v8  ;;  %v337_v29 = vmul.f32 %v1715_v10, %v1715_v10  ;;  %s1395_s25 = scalar_lea.vmem %s2083_s6, 4096  ;;  %p2152_p3 = scmp.ne.s32.totalorder %s2145_s22, 0 }
  0x5e   : > { %298 = vadd.xlane.f32.xlu1 %v1683_v2  ;;  %294 = vadd.xlane.f32.xlu0 %v1686_v3  ;;  %v1731_v14 = vld [vmem:[%s1660_s27 + $0x78] sm:$0xff]  ;;  %v255_v15 = vld [vmem:[%s1660_s27 + $0x70] sm:$0xff]  ;;  %v1738_v18 = vld [vmem:[%s1668_s20] sm:$0xff]  ;;  %v336_v28 = vmul.f32 %v1718_v11, %v1718_v11  ;;  %v338_v30 = vmul.f32 %v1726_v13, %v1726_v13  ;;  %v339_v31 = vmul.f32 %v1723_v12, %v1723_v12  ;;  %p1396_p0 = scmp.ne.s32.totalorder %s2083_s6, %s1395_s25  ;;  %s1488_s8 = smov [#allocation8]  }
  0x5f   : > { %v340_v32 = vmul.f32 %v255_v15, %v255_v15  ;;  %v341_v33 = vmul.f32 %v1731_v14, %v1731_v14  ;;  %v342_v34 = vmul.f32 %v1738_v18, %v1738_v18  ;;  %s1399_s15 = sshll.u32 %s1488_s8, 4  ;;  %s1400_s15 = int_to_ptr.vmem [resolvable:$false] %s1399_s15 }
  0x60   : > { %p1397_p11 = pnand %p1396_p0, %p2152_p3  ;;  %s1401_s16 = scalar_lea.vmem %s1400_s15, 8192 }
  0x61   : > { %p1402_p7 = scmp.lt.s32.totalorder %s2083_s6, %s1400_s15  ;;  %p1403_p10 = scmp.lt.s32.totalorder %s1401_s16, %s1395_s25 }
  0x62   : > { %302 = vadd.xlane.f32.xlu1 %v1691_v4  ;;  %300 = vadd.xlane.f32.xlu0 %v1694_v5  ;;  %p1398_p6 = pneg %p1397_p11 }
  0x63   : > { %p1404_p12 = por %p1403_p10, %p1402_p7 }
  0x65   : > { %p1405_p9 = pnand %p1404_p12, %p1398_p6 }
  0x66   : > { %306 = vadd.xlane.f32.xlu1 %v1699_v6  ;;  %304 = vadd.xlane.f32.xlu0 %v1702_v7 }
  0x6a   : > { %310 = vadd.xlane.f32.xlu1 %v1707_v8  ;;  %308 = vadd.xlane.f32.xlu0 %v1710_v9 }
  0x6e   : > { %314 = vadd.xlane.f32.xlu1 %v1715_v10  ;;  %312 = vadd.xlane.f32.xlu0 %v1718_v11 }
  0x72   : > { %318 = vadd.xlane.f32.xlu1 %v1723_v12  ;;  %316 = vadd.xlane.f32.xlu0 %v1726_v13 }
  0x76   : > { %322 = vadd.xlane.f32.xlu1 %v1731_v14  ;;  %320 = vadd.xlane.f32.xlu0 %v255_v15 }
  0x7a   : > { %324 = vadd.xlane.f32.xlu0 %v1738_v18  ;;  %343 = vadd.xlane.f32.xlu1 %v326_v17 }
  0x7e   : > { %345 = vadd.xlane.f32.xlu0 %v327_v19  ;;  %347 = vadd.xlane.f32.xlu1 %v328_v20 }
  0x82   : > { %349 = vadd.xlane.f32.xlu0 %v329_v21  ;;  %351 = vadd.xlane.f32.xlu1 %v330_v22 }
  0x86   : > { %353 = vadd.xlane.f32.xlu0 %v331_v23  ;;  %355 = vadd.xlane.f32.xlu1 %v332_v24 }
  0x8a   : > { %357 = vadd.xlane.f32.xlu0 %v333_v25  ;;  %359 = vadd.xlane.f32.xlu1 %v334_v26 }
  0x8e   : > { %361 = vadd.xlane.f32.xlu0 %v335_v27  ;;  %363 = vadd.xlane.f32.xlu1 %v336_v28 }
  0x92   : > { %365 = vadd.xlane.f32.xlu0 %v337_v29  ;;  %367 = vadd.xlane.f32.xlu1 %v338_v30 }
  0x96   : > { %369 = vadd.xlane.f32.xlu0 %v339_v31  ;;  %371 = vadd.xlane.f32.xlu1 %v340_v32 }
  0x9a   : > { %373 = vadd.xlane.f32.xlu0 %v341_v33  ;;  %375 = vadd.xlane.f32.xlu1 %v342_v34 }
  0xe7   : > { %v297_v35 = vpop.xlane.xlu1 %296  ;;  %v293_v36 = vpop.xlane.xlu0 %292 }
  0xe8   : > { %v398_v39 = vrot.slane %v297_v35, 1  ;;  %v395_v40 = vrot.slane %v293_v36, 1 }
  0xeb   : > { %v299_v37 = vpop.xlane.xlu1 %298  ;;  %v295_v38 = vpop.xlane.xlu0 %294 }
  0xec   : > { %v400_v41 = vrot.slane %v299_v37, 1  ;;  %v396_v42 = vrot.slane %v295_v38, 1 }
  0xee   : > { %v399_v43 = vsel %vm394_vm0, %v396_v42, %v398_v39  ;;  %v397_v44 = vsel %vm394_vm0, %v395_v40, %v396_v42  ;;  %v401_v45 = vsel %vm394_vm0, %v398_v39, %v400_v41 }
  0xef   : > { %v445_v46 = vadd.f32 %v399_v43, %v295_v38  ;;  %v303_v47 = vpop.xlane.xlu1 %302  ;;  %v301_v48 = vpop.xlane.xlu0 %300  ;;  %v444_v49 = vadd.f32 %v397_v44, %v293_v36  ;;  %v446_v53 = vadd.f32 %v401_v45, %v297_v35 }
  0xf0   : > { %v402_v50 = vrot.slane %v301_v48, 1  ;;  %v404_v54 = vrot.slane %v303_v47, 1 }
  0xf1   : > { %v1774_v51 = vmul.f32 0.00390625, %v445_v46  ;;  %v1776_v52 = vmul.f32 0.00390625, %v444_v49  ;;  %v1781_v58 = vmul.f32 0.00390625, %v446_v53 }
  0xf2   : > { %v403_v55 = vsel %vm394_vm0, %v400_v41, %v402_v50  ;;  %v405_v60 = vsel %vm394_vm0, %v402_v50, %v404_v54 }
  0xf3   : > { %v307_v56 = vpop.xlane.xlu1 %306  ;;  %656 = vperm.xlu0 %1297, %v1776_v52   ;;  %v305_v57 = vpop.xlane.xlu0 %304  ;;  %661 = vperm.xlu1 %1298, %v1774_v51   ;;  %v447_v59 = vadd.f32 %v403_v55, %v299_v37  ;;  %v448_v15 = vadd.f32 %v405_v60, %v301_v48 }
  0xf4   : > { %v406_v61 = vrot.slane %v305_v57, 1  ;;  %v408_v17 = vrot.slane %v307_v56, 1 }
  0xf5   : > { %v1785_v16 = vmul.f32 0.00390625, %v447_v59  ;;  %v546_v24 = vmul.f32 0.00390625, %v448_v15 }
  0xf6   : > { %v407_v19 = vsel %vm394_vm0, %v404_v54, %v406_v61  ;;  %v409_v26 = vsel %vm394_vm0, %v406_v61, %v408_v17 }
  0xf7   : > { %v311_v62 = vpop.xlane.xlu1 %310  ;;  %v309_v63 = vpop.xlane.xlu0 %308  ;;  %666 = vperm.xlu1 %1298, %v1781_v58   ;;  %v449_v25 = vadd.f32 %v407_v19, %v303_v47  ;;  %v450_v34 = vadd.f32 %v409_v26, %v305_v57  ;;  %v575_v19 = vmul.f32 %v1774_v51, %v1774_v51 }
  0xf8   : > { %v412_v22 = vrot.slane %v311_v62, 1  ;;  %v410_v27 = vrot.slane %v309_v63, 1 }
  0xf9   : > { %v547_v36 = vmul.f32 0.00390625, %v449_v25  ;;  %v548_v44 = vmul.f32 0.00390625, %v450_v34  ;;  %v577_v34 = vmul.f32 %v1785_v16, %v1785_v16 }
  0xfa   : > { %v411_v38 = vsel %vm394_vm0, %v408_v17, %v410_v27  ;;  %v413_v46 = vsel %vm394_vm0, %v410_v27, %v412_v22 }
  0xfb   : > { %v315_v20 = vpop.xlane.xlu1 %314  ;;  %v313_v21 = vpop.xlane.xlu0 %312  ;;  %671 = vperm.xlu1 %1298, %v1785_v16   ;;  %v451_v45 = vadd.f32 %v411_v38, %v307_v56  ;;  %v452_v57 = vadd.f32 %v413_v46, %v309_v63  ;;  %v579_v16 = vmul.f32 %v547_v36, %v547_v36 }
  0xfc   : > { %v414_v23 = vrot.slane %v313_v21, 1  ;;  %v416_v32 = vrot.slane %v315_v20, 1 }
  0xfd   : > { %v549_v60 = vmul.f32 0.00390625, %v451_v45  ;;  %v550_v63 = vmul.f32 0.00390625, %v452_v57 }
  0xfe   : > { %v415_v28 = vsel %vm394_vm0, %v412_v22, %v414_v23  ;;  %v417_v56 = vsel %vm394_vm0, %v414_v23, %v416_v32  ;;  %v574_v23 = vmul.f32 %v1776_v52, %v1776_v52 }
  0xff   : > { %v319_v29 = vpop.xlane.xlu1 %318  ;;  %v317_v30 = vpop.xlane.xlu0 %316  ;;  %676 = vperm.xlu1 %1298, %v546_v24   ;;  %v453_v31 = vadd.f32 %v415_v28, %v311_v62  ;;  %v454_v26 = vadd.f32 %v417_v56, %v313_v21 }
 0x100   : > { %v418_v33 = vrot.slane %v317_v30, 1  ;;  %v420_v41 = vrot.slane %v319_v29, 1 }
 0x101   : > { %v1791_v35 = vmul.f32 0.00390625, %v453_v31 }
 0x102   : > { %v419_v37 = vsel %vm394_vm0, %v416_v32, %v418_v33  ;;  %v421_v27 = vsel %vm394_vm0, %v418_v33, %v420_v41  ;;  %v1820_v32 = vmul.f32 %v546_v24, %v546_v24 }
 0x103   : > { %v323_v39 = vpop.xlane.xlu1 %322  ;;  %701 = vperm.xlu0 %1297, %v1791_v35   ;;  %v1796_v40 = vpop.xlane.xlu0 %320  ;;  %681 = vperm.xlu1 %1298, %v547_v36   ;;  %v455_v43 = vadd.f32 %v419_v37, %v315_v20  ;;  %v456_v52 = vadd.f32 %v421_v27, %v317_v30 }
 0x104   : > { %v422_v42 = vrot.slane %v1796_v40, 1  ;;  %v424_v54 = vrot.slane %v323_v39, 1 }
 0x105   : > { %v1800_v47 = vmul.f32 0.00390625, %v455_v43  ;;  %v552_v43 = vmul.f32 0.00390625, %v454_v26 }
 0x106   : > { %v423_v48 = vsel %vm394_vm0, %v420_v41, %v422_v42  ;;  %v425_v45 = vsel %vm394_vm0, %v422_v42, %v424_v54 }
 0x107   : > { %v325_v49 = vpop.xlane.xlu0 %324  ;;  %686 = vperm.xlu1 %1298, %v548_v44   ;;  %v344_v50 = vpop.xlane.xlu1 %343  ;;  %v457_v53 = vadd.f32 %v423_v48, %v319_v29  ;;  %711 = vperm.xlu0 %1297, %v1800_v47   ;;  %v576_v29 = vmul.f32 %v1781_v58, %v1781_v58  ;;  %v1828_v48 = vmul.f32 %v550_v63, %v550_v63 }
 0x108   : > { %v426_v55 = vrot.slane %v325_v49, 1  ;;  %v477_v20 = vrot.slane %v344_v50, 1 }
 0x109   : > { %v1804_v59 = vmul.f32 0.00390625, %v457_v53 }
 0x10a   : > { %v427_v61 = vsel %vm394_vm0, %v424_v54, %v426_v55 }
 0x10b   : > { %v346_v62 = vpop.xlane.xlu0 %345  ;;  %691 = vperm.xlu1 %1298, %v549_v60   ;;  %v348_v15 = vpop.xlane.xlu1 %347  ;;  %v459_v17 = vadd.f32 %v427_v61, %v323_v39  ;;  %721 = vperm.xlu0 %1297, %v1804_v59   ;;  %v1824_v39 = vmul.f32 %v548_v44, %v548_v44  ;;  %v554_v61 = vmul.f32 0.00390625, %v456_v52 }
 0x10c   : > { %v478_v22 = vrot.slane %v346_v62, 1  ;;  %v480_v25 = vrot.slane %v348_v15, 1 }
 0x10d   : > { %v1812_v28 = vmul.f32 0.00390625, %v459_v17 }
 0x10e   : > { %v479_v31 = vsel %vm394_vm0, %v477_v20, %v478_v22  ;;  %v481_v51 = vsel %vm394_vm0, %v478_v22, %v480_v25 }
 0x10f   : > { %v526_v21 = vadd.f32 %v479_v31, %v344_v50  ;;  %v527_v37 = vadd.f32 %v481_v51, %v346_v62  ;;  %v350_v33 = vpop.xlane.xlu0 %349  ;;  %696 = vperm.xlu1 %1298, %v550_v63   ;;  %v352_v38 = vpop.xlane.xlu1 %351  ;;  %731 = vperm.xlu0 %1297, %v1812_v28   ;;  %v458_v62 = vadd.f32 %v425_v45, %v1796_v40 }
 0x110   : > { %v482_v58 = vrot.slane %v350_v33, 1  ;;  %v484_v41 = vrot.slane %v352_v38, 1  ;;  %v1833_v63 = vmul.f32 %v552_v43, %v552_v43 }
 0x111   : > { %v558_v24 = vmul.f32 0.00390625, %v526_v21  ;;  %v559_v46 = vmul.f32 0.00390625, %v527_v37 }
 0x112   : > { %v483_v49 = vsel %vm394_vm0, %v480_v25, %v482_v58  ;;  %v485_v50 = vsel %vm394_vm0, %v482_v58, %v484_v41  ;;  %v581_v25 = vmul.f32 %v549_v60, %v549_v60  ;;  %v1837_v58 = vmul.f32 0.00390625, %v458_v62 }
 0x113   : > { %v590_v53 = vsub.f32 %v558_v24, %v574_v23  ;;  %v591_v44 = vsub.f32 %v559_v46, %v575_v19  ;;  %v528_v55 = vadd.f32 %v483_v49, %v348_v15  ;;  %v529_v30 = vadd.f32 %v485_v50, %v350_v33  ;;  %v354_v57 = vpop.xlane.xlu0 %353  ;;  %706 = vperm.xlu1 %1298, %v552_v43   ;;  %v356_v56 = vpop.xlane.xlu1 %355 }
 0x114   : > { %v486_v42 = vrot.slane %v354_v57, 1  ;;  %v488_v54 = vrot.slane %v356_v56, 1 }
 0x115   : > { %v606_v17 = vmax.f32 %v590_v53, 0.0  ;;  %v607_v20 = vmax.f32 %v591_v44, 0.0  ;;  %v560_v22 = vmul.f32 0.00390625, %v528_v55  ;;  %v561_v36 = vmul.f32 0.00390625, %v529_v30 }
 0x116   : > { %v487_v26 = vsel %vm394_vm0, %v484_v41, %v486_v42  ;;  %v489_v15 = vsel %vm394_vm0, %v486_v42, %v488_v54 }
 0x117   : > { %v622_v19 = vadd.f32 1e-05, %v606_v17  ;;  %v623_v27 = vadd.f32 1e-05, %v607_v20  ;;  %v592_v23 = vsub.f32 %v560_v22, %v576_v29  ;;  %v593_v31 = vsub.f32 %v561_v36, %v577_v34  ;;  %v358_v51 = vpop.xlane.xlu0 %357  ;;  %716 = vperm.xlu1 %1298, %v554_v61   ;;  %v360_v40 = vpop.xlane.xlu1 %359 }
 0x118   : > { %v530_v21 = vadd.f32 %v487_v26, %v352_v38  ;;  %v531_v37 = vadd.f32 %v489_v15, %v354_v57  ;;  %v490_v33 = vrot.slane %v358_v51, 1  ;;  %v492_v52 = vrot.slane %v360_v40, 1 }
 0x119   : > { %1299 = vrsqrt.f32 %v622_v19  ;;  %v608_v43 = vmax.f32 %v592_v23, 0.0  ;;  %v609_v60 = vmax.f32 %v593_v31, 0.0  ;;  %v583_v57 = vmul.f32 %v1791_v35, %v1791_v35 }
 0x11a   : > { %1301 = vrsqrt.f32 %v623_v27  ;;  %v562_v41 = vmul.f32 0.00390625, %v530_v21  ;;  %v563_v45 = vmul.f32 0.00390625, %v531_v37  ;;  %v491_v24 = vsel %vm394_vm0, %v488_v54, %v490_v33 }
 0x11b   : > { %v624_v46 = vadd.f32 1e-05, %v608_v43  ;;  %v625_v29 = vadd.f32 1e-05, %v609_v60  ;;  %v532_v34 = vadd.f32 %v491_v24, %v356_v56  ;;  %v493_v49 = vsel %vm394_vm0, %v490_v33, %v492_v52  ;;  %v362_v50 = vpop.xlane.xlu0 %361  ;;  %726 = vperm.xlu1 %1298, %v1837_v58   ;;  %v364_v38 = vpop.xlane.xlu1 %363 }
 0x11c   : > { %v594_v53 = vsub.f32 %v562_v41, %v1820_v32  ;;  %v595_v44 = vsub.f32 %v563_v45, %v579_v16  ;;  %v533_v55 = vadd.f32 %v493_v49, %v358_v51  ;;  %v494_v30 = vrot.slane %v362_v50, 1 }
 0x11d   : > { %1303 = vrsqrt.f32 %v624_v46  ;;  %v564_v62 = vmul.f32 0.00390625, %v532_v34  ;;  %v496_v42 = vrot.slane %v364_v38, 1  ;;  %v1845_v20 = vmul.f32 %v554_v61, %v554_v61 }
 0x11e   : > { %1305 = vrsqrt.f32 %v625_v29  ;;  %v610_v54 = vmax.f32 %v594_v53, 0.0  ;;  %v611_v56 = vmax.f32 %v595_v44, 0.0  ;;  %v565_v17 = vmul.f32 0.00390625, %v533_v55 }
 0x11f   : > { %v596_v22 = vsub.f32 %v564_v62, %v1824_v39  ;;  %v495_v36 = vsel %vm394_vm0, %v492_v52, %v494_v30  ;;  %v497_v32 = vsel %vm394_vm0, %v494_v30, %v496_v42  ;;  %v366_v16 = vpop.xlane.xlu0 %365  ;;  %v368_v26 = vpop.xlane.xlu1 %367  ;;  %v585_v61 = vmul.f32 %v1800_v47, %v1800_v47 }
 0x120   : > { %v626_v15 = vadd.f32 1e-05, %v610_v54  ;;  %v627_v19 = vadd.f32 1e-05, %v611_v56  ;;  %v597_v35 = vsub.f32 %v565_v17, %v581_v25  ;;  %v534_v27 = vadd.f32 %v495_v36, %v360_v40 }
 0x121   : > { %v612_v23 = vmax.f32 %v596_v22, 0.0  ;;  %v535_v31 = vadd.f32 %v497_v32, %v362_v50  ;;  %v498_v51 = vrot.slane %v366_v16, 1  ;;  %v500_v21 = vrot.slane %v368_v26, 1 }
 0x122   : > { %1307 = vrsqrt.f32 %v626_v15  ;;  %v613_v37 = vmax.f32 %v597_v35, 0.0  ;;  %v566_v39 = vmul.f32 0.00390625, %v534_v27  ;;  %v587_v30 = vmul.f32 %v1804_v59, %v1804_v59 }
 0x123   : > { %v1300_v33 = vpop.eup %1299  ;;  %1309 = vrsqrt.f32 %v627_v19  ;;  %v628_v52 = vadd.f32 1e-05, %v612_v23  ;;  %v567_v43 = vmul.f32 0.00390625, %v535_v31  ;;  %v499_v60 = vsel %vm394_vm0, %v496_v42, %v498_v51  ;;  %v370_v41 = vpop.xlane.xlu0 %369 }
 0x124   : > { %v372_v45 = vpop.xlane.xlu1 %371  ;;  %v1302_v25 = vpop.eup %1301  ;;  %v629_v40 = vadd.f32 1e-05, %v613_v37  ;;  %v598_v24 = vsub.f32 %v566_v39, %v1828_v48  ;;  %v536_v46 = vadd.f32 %v499_v60, %v364_v38  ;;  %v501_v29 = vsel %vm394_vm0, %v498_v51, %v500_v21  ;;  %752 = vperm.xlu1 %1298, %v1300_v33  }
 0x125   : > { %1311 = vrsqrt.f32 %v628_v52  ;;  %v599_v47 = vsub.f32 %v567_v43, %v583_v57  ;;  %v537_v34 = vadd.f32 %v501_v29, %v366_v16  ;;  %v502_v49 = vrot.slane %v370_v41, 1  ;;  %757 = vperm.xlu0 %1297, %v1302_v25  }
 0x126   : > { %1313 = vrsqrt.f32 %v629_v40  ;;  %v614_v50 = vmax.f32 %v598_v24, 0.0  ;;  %v568_v53 = vmul.f32 0.00390625, %v536_v46  ;;  %v504_v44 = vrot.slane %v372_v45, 1 }
 0x127   : > { %v1304_v55 = vpop.eup %1303  ;;  %v615_v62 = vmax.f32 %v599_v47, 0.0  ;;  %v569_v42 = vmul.f32 0.00390625, %v537_v34  ;;  %v503_v48 = vsel %vm394_vm0, %v500_v21, %v502_v49  ;;  %v374_v38 = vpop.xlane.xlu0 %373  ;;  %v588_v60 = vmul.f32 %v1837_v58, %v1837_v58 }
 0x128   : > { %v376_v54 = vpop.xlane.xlu1 %375  ;;  %v1306_v56 = vpop.eup %1305  ;;  %v630_v17 = vadd.f32 1e-05, %v614_v50  ;;  %v600_v57 = vsub.f32 %v568_v53, %v1833_v63  ;;  %v538_v22 = vadd.f32 %v503_v48, %v368_v26  ;;  %v505_v36 = vsel %vm394_vm0, %v502_v49, %v504_v44  ;;  %762 = vperm.xlu1 %1298, %v1304_v55  }
 0x129   : > { %v631_v32 = vadd.f32 1e-05, %v615_v62  ;;  %v601_v16 = vsub.f32 %v569_v42, %v585_v61  ;;  %v539_v15 = vadd.f32 %v505_v36, %v370_v41  ;;  %v506_v19 = vrot.slane %v374_v38, 1  ;;  %767 = vperm.xlu0 %1297, %v1306_v56  }
 0x12a   : > { %1315 = vrsqrt.f32 %v630_v17  ;;  %v616_v59 = vmax.f32 %v600_v57, 0.0  ;;  %v570_v35 = vmul.f32 0.00390625, %v538_v22  ;;  %v508_v27 = vrot.slane %v376_v54, 1 }
 0x12b   : > { %1317 = vrsqrt.f32 %v631_v32  ;;  %v617_v23 = vmax.f32 %v601_v16, 0.0  ;;  %v571_v31 = vmul.f32 0.00390625, %v539_v15  ;;  %v507_v51 = vsel %vm394_vm0, %v504_v44, %v506_v19 }
 0x12c   : > { %v1308_v21 = vpop.eup %1307  ;;  %v632_v63 = vadd.f32 1e-05, %v616_v59  ;;  %v602_v26 = vsub.f32 %v570_v35, %v1845_v20  ;;  %v540_v37 = vadd.f32 %v507_v51, %v372_v45  ;;  %v509_v39 = vsel %vm394_vm0, %v506_v19, %v508_v27 }
 0x12d   : > { %v1310_v61 = vpop.eup %1309  ;;  %v633_v33 = vadd.f32 1e-05, %v617_v23  ;;  %v603_v52 = vsub.f32 %v571_v31, %v587_v30  ;;  %v541_v43 = vadd.f32 %v509_v39, %v374_v38  ;;  %772 = vperm.xlu1 %1298, %v1308_v21   ;;  %v589_v24 = vmul.f32 %v1812_v28, %v1812_v28 }
 0x12e   : > { %1319 = vrsqrt.f32 %v632_v63  ;;  %v618_v41 = vmax.f32 %v602_v26, 0.0  ;;  %v572_v25 = vmul.f32 0.00390625, %v540_v37  ;;  %777 = vperm.xlu0 %1297, %v1310_v61  }
 0x12f   : > { %v1312_v40 = vpop.eup %1311  ;;  %1321 = vrsqrt.f32 %v633_v33  ;;  %v619_v20 = vmax.f32 %v603_v52, 0.0  ;;  %v573_v45 = vmul.f32 0.00390625, %v541_v43 }
 0x130   : > { %v1314_v46 = vpop.eup %1313  ;;  %v634_v29 = vadd.f32 1e-05, %v618_v41  ;;  %v604_v47 = vsub.f32 %v572_v25, %v588_v60 }
 0x131   : > { %v635_v34 = vadd.f32 1e-05, %v619_v20  ;;  %v605_v49 = vsub.f32 %v573_v45, %v589_v24  ;;  %782 = vperm.xlu1 %1298, %v1312_v40  }
 0x132   : > { %1323 = vrsqrt.f32 %v634_v29  ;;  %v620_v50 = vmax.f32 %v604_v47, 0.0  ;;  %787 = vperm.xlu0 %1297, %v1314_v46  }
 0x133   : > { %1325 = vrsqrt.f32 %v635_v34  ;;  %v621_v58 = vmax.f32 %v605_v49, 0.0 }
 0x134   : > { %v1316_v53 = vpop.eup %1315  ;;  %v636_v44 = vadd.f32 1e-05, %v620_v50 }
 0x135   : > { %v1318_v55 = vpop.eup %1317  ;;  %v637_v30 = vadd.f32 1e-05, %v621_v58  ;;  %792 = vperm.xlu1 %1298, %v1316_v53  }
 0x136   : > { %1327 = vrsqrt.f32 %v636_v44  ;;  %797 = vperm.xlu0 %1297, %v1318_v55  }
 0x137   : > { %1329 = vrsqrt.f32 %v637_v30 }
 0x138   : > { %v1320_v28 = vpop.eup %1319 }
 0x139   : > { %v1322_v62 = vpop.eup %1321  ;;  %802 = vperm.xlu1 %1298, %v1320_v28  }
 0x13a   : > { %807 = vperm.xlu0 %1297, %v1322_v62  }
 0x13c   : > { %v1324_v42 = vpop.eup %1323 }
 0x13d   : > { %v1326_v48 = vpop.eup %1325  ;;  %812 = vperm.xlu1 %1298, %v1324_v42  }
 0x13e   : > { %817 = vperm.xlu0 %1297, %v1326_v48  }
 0x140   : > { %v1328_v38 = vpop.eup %1327 }
 0x141   : > { %v1330_v54 = vpop.eup %1329  ;;  %822 = vperm.xlu1 %1298, %v1328_v38  }
 0x142   : > { %827 = vperm.xlu0 %1297, %v1330_v54  }
 0x172   : > { %v662_v56 = vpop.permute.xlu1 %661  ;;  %v657_v16 = vpop.permute.xlu0 %656 }
 0x173   : > { %v863_v31 = vrot.slane %v657_v16, 7  ;;  %v864_v51 = vrot.slane %v662_v56, 7  ;;  %v734_v43 = vsub.f32 %v1678_v1, %v657_v16  ;;  %v735_v40 = vsub.f32 %v1686_v3, %v662_v56 }
 0x175   : > { %v865_v39 = vsel %vm862_vm1, %v863_v31, %v864_v51  ;;  %v911_v25 = vsub.f32 %v1678_v1, %v863_v31 }
 0x176   : > { %v1867_v17 = vpop.permute.xlu1 %666  ;;  %v912_v24 = vsub.f32 %v1686_v3, %v865_v39 }
 0x177   : > { %v866_v63 = vrot.slane %v1867_v17, 7  ;;  %v736_v45 = vsub.f32 %v1675_v0, %v1867_v17 }
 0x179   : > { %v867_v61 = vsel %vm862_vm1, %v864_v51, %v866_v63 }
 0x17a   : > { %v1869_v57 = vpop.permute.xlu1 %671  ;;  %v913_v46 = vsub.f32 %v1675_v0, %v867_v61 }
 0x17b   : > { %v868_v26 = vrot.slane %v1869_v57, 7  ;;  %v737_v29 = vsub.f32 %v1683_v2, %v1869_v57 }
 0x17d   : > { %v869_v60 = vsel %vm862_vm1, %v866_v63, %v868_v26 }
 0x17e   : > { %v1871_v22 = vpop.permute.xlu1 %676  ;;  %v914_v34 = vsub.f32 %v1683_v2, %v869_v60 }
 0x17f   : > { %v870_v37 = vrot.slane %v1871_v22, 7  ;;  %v738_v1 = vsub.f32 %v1694_v5, %v1871_v22 }
 0x181   : > { %v1908_v20 = vsel %vm862_vm1, %v868_v26, %v870_v37 }
 0x182   : > { %v1873_v36 = vpop.permute.xlu1 %681  ;;  %v1879_v19 = vpop.permute.xlu0 %701  ;;  %v915_v58 = vsub.f32 %v1694_v5, %v1908_v20 }
 0x183   : > { %v872_v33 = vrot.slane %v1873_v36, 7  ;;  %v743_v0 = vsub.f32 %v1707_v8, %v1879_v19  ;;  %v880_v2 = vrot.slane %v1879_v19, 7  ;;  %v739_v30 = vsub.f32 %v1691_v4, %v1873_v36 }
 0x185   : > { %v1920_v3 = vsel %vm862_vm1, %v870_v37, %v872_v33 }
 0x186   : > { %v1875_v32 = vpop.permute.xlu1 %686  ;;  %v1885_v27 = vpop.permute.xlu0 %711  ;;  %v916_v42 = vsub.f32 %v1691_v4, %v1920_v3 }
 0x187   : > { %v874_v47 = vrot.slane %v1875_v32, 7  ;;  %v740_v48 = vsub.f32 %v1702_v7, %v1875_v32  ;;  %v745_v56 = vsub.f32 %v1715_v10, %v1885_v27  ;;  %v884_v17 = vrot.slane %v1885_v27, 7 }
 0x189   : > { %v1935_v38 = vsel %vm862_vm1, %v872_v33, %v874_v47 }
 0x18a   : > { %v1877_v15 = vpop.permute.xlu1 %691  ;;  %v1889_v21 = vpop.permute.xlu0 %721  ;;  %v917_v63 = vsub.f32 %v1702_v7, %v1935_v38 }
 0x18b   : > { %v876_v49 = vrot.slane %v1877_v15, 7  ;;  %v741_v26 = vsub.f32 %v1699_v6, %v1877_v15  ;;  %v747_v61 = vsub.f32 %v1723_v12, %v1889_v21 }
 0x18d   : > { %v1944_v57 = vsel %vm862_vm1, %v874_v47, %v876_v49 }
 0x18e   : > { %v1881_v59 = vpop.permute.xlu1 %696  ;;  %v1901_v41 = vpop.permute.xlu0 %731  ;;  %v918_v7 = vsub.f32 %v1699_v6, %v1944_v57 }
 0x18f   : > { %v878_v33 = vrot.slane %v1881_v59, 7 }
 0x192   : > { %v1883_v35 = vpop.permute.xlu1 %706 }
 0x193   : > { %v882_v38 = vrot.slane %v1883_v35, 7 }
 0x195   : > { %v883_v5 = vsel %vm862_vm1, %v880_v2, %v882_v38 }
 0x196   : > { %v1887_v23 = vpop.permute.xlu1 %716 }
 0x19a   : > { %v1897_v52 = vpop.permute.xlu1 %726 }
 0x1a3   : > { %v753_v50 = vpop.permute.xlu1 %752 }
 0x1a4   : > { %v758_v53 = vpop.permute.xlu0 %757  ;;  %v830_v44 = vmul.f32 %v753_v50, %v734_v43  ;;  %v928_v55 = vrot.slane %v753_v50, 7  ;;  %v749_v50 = vsub.f32 %v1731_v14, %v1901_v41 }
 0x1a5   : > { %v831_v28 = vmul.f32 %v758_v53, %v735_v40  ;;  %v929_v62 = vrot.slane %v758_v53, 7 }
 0x1a6   : > { %846 = vst [vmem:[%s1937_s28] sm:$0xff] %v830_v44  ;;  %v976_v54 = vmul.f32 %v928_v55, %v911_v25  ;;  %v888_v25 = vrot.slane %v1889_v21, 7 }
 0x1a7   : > { %847 = vst [vmem:[%s1937_s28 + $0x10] sm:$0xff] %v831_v28  ;;  %v930_v4 = vsel %vm862_vm1, %v928_v55, %v929_v62  ;;  %v763_v22 = vpop.permute.xlu1 %762  ;;  %v879_v55 = vsel %vm862_vm1, %v876_v49, %v878_v33 }
 0x1a8   : > { %v977_v36 = vmul.f32 %v930_v4, %v912_v24  ;;  %v1010_v32 = vrot.slane %v976_v54, 1  ;;  %v768_v16 = vpop.permute.xlu0 %767  ;;  %v832_v31 = vmul.f32 %v763_v22, %v736_v45  ;;  %v931_v51 = vrot.slane %v763_v22, 7 }
 0x1a9   : > { %v833_v37 = vmul.f32 %v768_v16, %v737_v29  ;;  %v933_v39 = vrot.slane %v768_v16, 7  ;;  %v892_v24 = vrot.slane %v1901_v41, 7  ;;  %v742_v45 = vsub.f32 %v1710_v9, %v1881_v59 }
 0x1aa   : > { %v1011_v43 = vrot.slane %v977_v36, 1  ;;  %848 = vst [vmem:[%s1937_s28 + $0x20] sm:$0xff] %v832_v31  ;;  %v932_v60 = vsel %vm862_vm1, %v929_v62, %v931_v51  ;;  %v919_v36 = vsub.f32 %v1710_v9, %v879_v55  ;;  %v885_v9 = vsel %vm862_vm1, %v882_v38, %v884_v17 }
 0x1ab   : > { %849 = vst [vmem:[%s1937_s28 + $0x30] sm:$0xff] %v833_v37  ;;  %v934_v15 = vsel %vm862_vm1, %v931_v51, %v933_v39  ;;  %v978_v40 = vmul.f32 %v932_v60, %v913_v46  ;;  %v746_v38 = vsub.f32 %v1726_v13, %v1887_v23 }
 0x1ac   : > { %v1012_v29 = vsel %vm394_vm0, %v1010_v32, %v1011_v43  ;;  %v979_v47 = vmul.f32 %v934_v15, %v914_v34  ;;  %v773_v3 = vpop.permute.xlu1 %772  ;;  %v881_v34 = vsel %vm862_vm1, %v878_v33, %v880_v2 }
 0x1ad   : > { %1059 = vst [vmem:[%s1937_s28 + $0x8] sm:$0xff] %v1012_v29  ;;  %v1013_v6 = vrot.slane %v978_v40, 1  ;;  %v778_v53 = vpop.permute.xlu0 %777  ;;  %v834_v44 = vmul.f32 %v773_v3, %v738_v1  ;;  %v935_v46 = vrot.slane %v773_v3, 7  ;;  %v1980_v1 = vsub.f32 %v1738_v18, %v892_v24 }
 0x1ae   : > { %v1015_v28 = vrot.slane %v979_v47, 1  ;;  %v835_v59 = vmul.f32 %v778_v53, %v739_v30  ;;  %v937_v62 = vrot.slane %v778_v53, 7  ;;  %v920_v51 = vsub.f32 %v1707_v8, %v881_v34 }
 0x1af   : > { %v1014_v54 = vsel %vm394_vm0, %v1011_v43, %v1013_v6  ;;  %850 = vst [vmem:[%s1937_s28 + $0x40] sm:$0xff] %v834_v44  ;;  %v936_v57 = vsel %vm862_vm1, %v933_v39, %v935_v46  ;;  %v744_v3 = vsub.f32 %v1718_v11, %v1883_v35  ;;  %v921_v44 = vsub.f32 %v1718_v11, %v883_v5 }
 0x1b0   : > { %v1016_v49 = vsel %vm394_vm0, %v1013_v6, %v1015_v28  ;;  %1060 = vst [vmem:[%s1937_s28 + $0x18] sm:$0xff] %v1014_v54  ;;  %851 = vst [vmem:[%s1937_s28 + $0x50] sm:$0xff] %v835_v59  ;;  %v938_v30 = vsel %vm862_vm1, %v935_v46, %v937_v62  ;;  %v980_v4 = vmul.f32 %v936_v57, %v915_v58  ;;  %v783_v22 = vpop.permute.xlu1 %782 }
 0x1b1   : > { %1061 = vst [vmem:[%s1937_s28 + $0x28] sm:$0xff] %v1016_v49  ;;  %v981_v32 = vmul.f32 %v938_v30, %v916_v42  ;;  %v788_v16 = vpop.permute.xlu0 %787  ;;  %v836_v18 = vmul.f32 %v783_v22, %v740_v48  ;;  %v939_v31 = vrot.slane %v783_v22, 7  ;;  %v886_v42 = vrot.slane %v1887_v23, 7 }
 0x1b2   : > { %v1017_v37 = vrot.slane %v980_v4, 1  ;;  %v837_v39 = vmul.f32 %v788_v16, %v741_v26  ;;  %v941_v33 = vrot.slane %v788_v16, 7  ;;  %v922_v46 = vsub.f32 %v1715_v10, %v885_v9  ;;  %v1332_v9 = vld [vmem:[%s1660_s27 + $0x70] sm:$0xff] }
 0x1b3   : > { %v1019_v20 = vrot.slane %v981_v32, 1  ;;  %852 = vst [vmem:[%s1937_s28 + $0x60] sm:$0xff] %v836_v18  ;;  %v940_v58 = vsel %vm862_vm1, %v937_v62, %v939_v31  ;;  %v887_v35 = vsel %vm862_vm1, %v884_v17, %v886_v42  ;;  %v889_v49 = vsel %vm862_vm1, %v886_v42, %v888_v25 }
 0x1b4   : > { %v1018_v48 = vsel %vm394_vm0, %v1015_v28, %v1017_v37  ;;  %853 = vst [vmem:[%s1937_s28 + $0x70] sm:$0xff] %v837_v39  ;;  %v942_v26 = vsel %vm862_vm1, %v939_v31, %v941_v33  ;;  %v982_v43 = vmul.f32 %v940_v58, %v917_v63  ;;  %v793_v60 = vpop.permute.xlu1 %792  ;;  %v890_v30 = vrot.slane %v1897_v52, 7 }
 0x1b5   : > { %v1020_v2 = vsel %vm394_vm0, %v1017_v37, %v1019_v20  ;;  %1062 = vst [vmem:[%s1937_s28 + $0x38] sm:$0xff] %v1018_v48  ;;  %v983_v15 = vmul.f32 %v942_v26, %v918_v7  ;;  %v798_v40 = vpop.permute.xlu0 %797  ;;  %v838_v29 = vmul.f32 %v793_v60, %v742_v45  ;;  %v943_v47 = vrot.slane %v793_v60, 7  ;;  %v1331_v37 = vld [vmem:[%s1660_s27 + $0x68] sm:$0xff] }
 0x1b6   : > { %1063 = vst [vmem:[%s1937_s28 + $0x48] sm:$0xff] %v1020_v2  ;;  %v1021_v6 = vrot.slane %v982_v43, 1  ;;  %v839_v63 = vmul.f32 %v798_v40, %v743_v0  ;;  %v945_v53 = vrot.slane %v798_v40, 7  ;;  %v923_v22 = vsub.f32 %v1726_v13, %v887_v35 }
 0x1b7   : > { %v1023_v7 = vrot.slane %v983_v15, 1  ;;  %854 = vst [vmem:[%s1937_s28 + $0x80] sm:$0xff] %v838_v29  ;;  %v944_v45 = vsel %vm862_vm1, %v941_v33, %v943_v47  ;;  %v924_v39 = vsub.f32 %v1331_v37, %v889_v49  ;;  %v891_v58 = vsel %vm862_vm1, %v888_v25, %v890_v30 }
 0x1b8   : > { %v1022_v55 = vsel %vm394_vm0, %v1019_v20, %v1021_v6  ;;  %855 = vst [vmem:[%s1937_s28 + $0x90] sm:$0xff] %v839_v63  ;;  %v946_v8 = vsel %vm862_vm1, %v943_v47, %v945_v53  ;;  %v984_v19 = vmul.f32 %v944_v45, %v919_v36  ;;  %v803_v0 = vpop.permute.xlu1 %802  ;;  %v748_v20 = vsub.f32 %v1332_v9, %v1897_v52 }
 0x1b9   : > { %v1024_v11 = vsel %vm394_vm0, %v1021_v6, %v1023_v7  ;;  %1064 = vst [vmem:[%s1937_s28 + $0x58] sm:$0xff] %v1022_v55  ;;  %v985_v28 = vmul.f32 %v946_v8, %v920_v51  ;;  %v808_v59 = vpop.permute.xlu0 %807  ;;  %v840_v62 = vmul.f32 %v803_v0, %v744_v3  ;;  %v947_v34 = vrot.slane %v803_v0, 7  ;;  %v1333_v3 = vld [vmem:[%s1660_s27 + $0x78] sm:$0xff] }
 0x1ba   : > { %1065 = vst [vmem:[%s1937_s28 + $0x68] sm:$0xff] %v1024_v11  ;;  %v1025_v17 = vrot.slane %v984_v19, 1  ;;  %v841_v54 = vmul.f32 %v808_v59, %v745_v56  ;;  %v949_v57 = vrot.slane %v808_v59, 7  ;;  %v893_v26 = vsel %vm862_vm1, %v890_v30, %v892_v24 }
 0x1bb   : > { %v1027_v4 = vrot.slane %v985_v28, 1  ;;  %856 = vst [vmem:[%s1937_s28 + $0xa0] sm:$0xff] %v840_v62  ;;  %v948_v23 = vsel %vm862_vm1, %v945_v53, %v947_v34  ;;  %v925_v40 = vsub.f32 %v1332_v9, %v891_v58  ;;  %v926_v6 = vsub.f32 %v1333_v3, %v893_v26 }
 0x1bc   : > { %v1026_v36 = vsel %vm394_vm0, %v1023_v7, %v1025_v17  ;;  %857 = vst [vmem:[%s1937_s28 + $0xb0] sm:$0xff] %v841_v54  ;;  %v950_v10 = vsel %vm862_vm1, %v947_v34, %v949_v57  ;;  %v986_v27 = vmul.f32 %v948_v23, %v921_v44  ;;  %v813_v56 = vpop.permute.xlu1 %812 }
 0x1bd   : > { %v1028_v32 = vsel %vm394_vm0, %v1025_v17, %v1027_v4  ;;  %1066 = vst [vmem:[%s1937_s28 + $0x78] sm:$0xff] %v1026_v36  ;;  %v987_v16 = vmul.f32 %v950_v10, %v922_v46  ;;  %v818_v18 = vpop.permute.xlu0 %817  ;;  %v842_v31 = vmul.f32 %v813_v56, %v746_v38  ;;  %v951_v51 = vrot.slane %v813_v56, 7 }
 0x1be   : > { %1067 = vst [vmem:[%s1937_s28 + $0x88] sm:$0xff] %v1028_v32  ;;  %v1029_v13 = vrot.slane %v986_v27, 1  ;;  %v843_v33 = vmul.f32 %v818_v18, %v747_v61  ;;  %v953_v5 = vrot.slane %v818_v18, 7 }
 0x1bf   : > { %v1031_v42 = vrot.slane %v987_v16, 1  ;;  %858 = vst [vmem:[%s1937_s28 + $0xc0] sm:$0xff] %v842_v31  ;;  %v952_v48 = vsel %vm862_vm1, %v949_v57, %v951_v51 }
 0x1c0   : > { %v1030_v12 = vsel %vm394_vm0, %v1027_v4, %v1029_v13  ;;  %859 = vst [vmem:[%s1937_s28 + $0xd0] sm:$0xff] %v843_v33  ;;  %v954_v61 = vsel %vm862_vm1, %v951_v51, %v953_v5  ;;  %v988_v52 = vmul.f32 %v952_v48, %v923_v22  ;;  %v823_v21 = vpop.permute.xlu1 %822 }
 0x1c1   : > { %v1032_v25 = vsel %vm394_vm0, %v1029_v13, %v1031_v42  ;;  %1068 = vst [vmem:[%s1937_s28 + $0x98] sm:$0xff] %v1030_v12  ;;  %v989_v43 = vmul.f32 %v954_v61, %v924_v39  ;;  %v828_v60 = vpop.permute.xlu0 %827  ;;  %v844_v2 = vmul.f32 %v823_v21, %v748_v20  ;;  %v955_v15 = vrot.slane %v823_v21, 7 }
 0x1c2   : > { %1069 = vst [vmem:[%s1937_s28 + $0xa8] sm:$0xff] %v1032_v25  ;;  %v1033_v24 = vrot.slane %v988_v52, 1  ;;  %v845_v29 = vmul.f32 %v828_v60, %v749_v50  ;;  %v957_v47 = vrot.slane %v828_v60, 7 }
 0x1c3   : > { %v1035_v63 = vrot.slane %v989_v43, 1  ;;  %860 = vst [vmem:[%s1937_s28 + $0xe0] sm:$0xff] %v844_v2  ;;  %v956_v53 = vsel %vm862_vm1, %v953_v5, %v955_v15 }
 0x1c4   : > { %v1034_v44 = vsel %vm394_vm0, %v1031_v42, %v1033_v24  ;;  %861 = vst [vmem:[%s1937_s28 + $0xf0] sm:$0xff] %v845_v29  ;;  %v992_v46 = vmul.f32 %v957_v47, %v1980_v1  ;;  %v958_v7 = vsel %vm862_vm1, %v955_v15, %v957_v47  ;;  %v990_v45 = vmul.f32 %v956_v53, %v925_v40 }
 0x1c5   : > { %v1036_v14 = vsel %vm394_vm0, %v1033_v24, %v1035_v63  ;;  %1070 = vst [vmem:[%s1937_s28 + $0xb8] sm:$0xff] %v1034_v44  ;;  %v991_v41 = vmul.f32 %v958_v7, %v926_v6 }
 0x1c6   : > { %1071 = vst [vmem:[%s1937_s28 + $0xc8] sm:$0xff] %v1036_v14  ;;  %v1041_v50 = vrot.slane %v992_v46, 1  ;;  %v1037_v35 = vrot.slane %v990_v45, 1 }
 0x1c7   : > { %v1039_v55 = vrot.slane %v991_v41, 1 }
 0x1c8   : > { %v1038_v1 = vsel %vm394_vm0, %v1035_v63, %v1037_v35 }
 0x1c9   : > { %v1040_v8 = vsel %vm394_vm0, %v1037_v35, %v1039_v55  ;;  %v1042_v19 = vsel %vm394_vm0, %v1039_v55, %v1041_v50  ;;  %1072 = vst [vmem:[%s1937_s28 + $0xd8] sm:$0xff] %v1038_v1 }
 0x1ca   : > { %1073 = vst [vmem:[%s1937_s28 + $0xe8] sm:$0xff] %v1040_v8  ;;  %1074 = vst [vmem:[%s1937_s28 + $0xf8] sm:$0xff] %v1042_v19 }
 0x1cb   : > { %1408 = shalt.err (!%p1405_p9)
}
 0x1cc   : > { %s1409_s26 = scalar_lea.hbm %s2081_s7, 4096  ;;  %s1413_s30 = scalar_lea.hbm %s2140_s2, 8192 }
 0x1cd   : > { %p1410_p1 = scmp.ne.s32.totalorder %s2081_s7, %s1409_s26  ;;  %p1414_p4 = scmp.lt.u32.totalorder %s2081_s7, %s2140_s2 }
 0x1ce   : > { %p1415_p13 = scmp.lt.u32.totalorder %s1413_s30, %s1409_s26  ;;  %p1417_p0 = scmp.lt.u32.totalorder %s1409_s26, %s2081_s7 }
 0x1cf   : > { %p1411_p5 = pnand %p1410_p1, %p2152_p3 }
 0x1d0   : > { %p1416_p8 = por %p1415_p13, %p1414_p4 }
 0x1d1   : > { %p1412_p2 = pneg %p1411_p5 }
 0x1d2   : > { %p1418_p11 = por %p1417_p0, %p1416_p8 }
 0x1d4   : > { %p1419_p6 = pnand %p1418_p11, %p1412_p2 }
 0x1d6   : > { %1422 = shalt.err (!%p1419_p6)
}
 0x1d7   : > { %s1489_s21 = smov 256   ;;  %s1490_s28 = smov 16  }
 0x1d8   : > { %1229 = dma.vmem_to_hbm [thread:$0]  (%p2152_p3), %s2083_s6, 4096, %s2081_s7, %s1076_s12, %s1489_s21, %s1489_s21, %s1490_s28  }
 0x1d9 PF: > { %s1107_s29 = sand.u32 1, %s1461_s9   ;;  %p2153_p7 = scmp.ne.s32.totalorder %s2146_s24, 0 }
 0x1da   : > { %p2154_p10 = scmp.ge.s32.totalorder %s1481_s14, 2  ;;  %s1108_s3 = scalar_lea.sflag [#allocation5], %s1107_s29 }
 0x1dc   : > { %p1239_p12 = pnand %p2154_p10, %p2153_p7 }
 0x1de   : > { %1456 = dma.done.wait (!%p1239_p12), %s1108_s3, 4096  }
 0x1df   : > { %1458 = vsyncadd (!%p1239_p12), %s1108_s3, 4294963200  ;;  %s21_s14 = sadd.s32 1, %s1481_s14   ;;  %s2155_s9 = smov %s1465_s10 }
 0x1e0   : > { %p18_p9 = scmp.ge.s32.totalorder %s21_s14, 4   ;;  %s2156_s10 = smov %s1469_s11 }
 0x1e1   : > { %s2157_s11 = smov %s1562_s23  ;;  %s2158_s12 = smov %s1477_s13 }
 0x1e2   : > { %s2159_s13 = smov %s2161_s17  ;;  %20 = sbr.rel (!%p18_p9) target bundleno = 8 (0x8), region = 86 }
 0x1e9   :  { %1113 = vsyncpa [#allocation4], 1 }
 0x1ea   :  { %1115 = vsyncpa [#allocation4 + $0x1], 1 }
 0x1eb   :  { %1116 = vsyncpa [#allocation7], 1 }
 0x1ec   :  { %1118 = vsyncpa [#allocation7 + $0x1], 1 }
 0x1ed   :  { %1119 = vsyncpa [#allocation5], 1 }
 0x1ee   :  { %1121 = vsyncpa [#allocation5 + $0x1], 1 }

</bundles_post_ra>
